<compile_context>
chip_gen: v7x
topology: tpu7x:2x2x1
jax: 0.10.0
libtpu: 0.0.40
codegen_flags: <defaults>
</compile_context>

<pallas_src>
import functools

import jax
import jax.numpy as jnp
from jax.experimental import pallas as pl
from jax.experimental.pallas import tpu as pltpu


def _focal_loss_kernel(logits_ref, tgt_ref, out_ref, acc_ref, *, alpha, gamma, hw_valid):
    # logits_ref: (1, C, tile_r, L)  tgt_ref: (1, 1, tile_r, L) int32
    # out_ref:    (1, 8, 128)        acc_ref: (tile_r, L) f32 scratch
    j = pl.program_id(1)
    num_classes = logits_ref.shape[1]

    @pl.when(j == 0)
    def _():
        acc_ref[...] = jnp.zeros_like(acc_ref)

    t = tgt_ref[0, 0, :, :]                                   # (tile_r, L) int32

    # Unrolled over the (static, small) class axis: pure VPU work per row.
    rows = [logits_ref[0, c, :, :].astype(jnp.float32) for c in range(num_classes)]

    m = rows[0]
    for c in range(1, num_classes):
        m = jnp.maximum(m, rows[c])

    sum_exp = jnp.zeros_like(m)
    x_t = jnp.zeros_like(m)
    for c in range(num_classes):
        sum_exp = sum_exp + jnp.exp(rows[c] - m)
        x_t = x_t + jnp.where(t == c, rows[c], 0.0)

    lse = m + jnp.log(sum_exp)
    ce = jnp.maximum(lse - x_t, 0.0)          # cross entropy; clamp so pt <= 1
    pt = jnp.exp(-ce)

    one_minus_pt = 1.0 - pt
    g_int = int(gamma)
    if float(gamma) == float(g_int) and 0 <= g_int <= 8:
        w = jnp.ones_like(one_minus_pt)       # multiply chain: no pow -> no extra EUP ops
        for _ in range(g_int):
            w = w * one_minus_pt
    else:
        w = jnp.power(jnp.maximum(one_minus_pt, 0.0), gamma)

    fl = (alpha * w) * ce                     # (tile_r, L)

    if hw_valid is not None:                  # mask padded pixels (static branch)
        tr, lw = fl.shape
        r_idx = jax.lax.broadcasted_iota(jnp.int32, fl.shape, 0)
        l_idx = jax.lax.broadcasted_iota(jnp.int32, fl.shape, 1)
        flat = (j * tr + r_idx) * lw + l_idx
        fl = jnp.where(flat < hw_valid, fl, 0.0)

    acc_ref[...] += fl                        # VPU-only steady state

    @pl.when(j == pl.num_programs(1) - 1)
    def _():
        s = jnp.sum(acc_ref[...])             # one XLU reduction per sample
        out_ref[...] = jnp.full(out_ref.shape, s, dtype=out_ref.dtype)


def focal_loss_pallas(inputs, targets, alpha=1.0, gamma=2.0,
                      tile_px_target=8192, lane_max=512):
    """inputs: (N, C, H, W) float logits; targets: (N, H, W) int class ids."""
    N, C, H, W = inputs.shape
    HW = H * W

    def rup(a, b):
        return (a + b - 1) // b * b

    # Pixel layout: HW -> (R_pad, L) with L a multiple of 128 and tile_r a
    # multiple of 8, so every block is fully lane/sublane dense.
    L = min(lane_max, rup(HW, 128))
    R = -(-HW // L)
    tile_r = min(rup(R, 8), max(8, (tile_px_target // L) // 8 * 8))
    R_pad = rup(R, tile_r)
    HW_pad = R_pad * L
    num_tiles = R_pad // tile_r

    # No transpose: NCHW is already classes-major / pixels-minor.
    logits = inputs.reshape(N, C, HW)
    tgt = targets.reshape(N, 1, HW).astype(jnp.int32)
    if HW_pad != HW:
        logits = jnp.pad(logits, ((0, 0), (0, 0), (0, HW_pad - HW)))
        tgt = jnp.pad(tgt, ((0, 0), (0, 0), (0, HW_pad - HW)))
    logits = logits.reshape(N, C, R_pad, L)
    tgt = tgt.reshape(N, 1, R_pad, L)

    kernel = functools.partial(
        _focal_loss_kernel,
        alpha=float(alpha),
        gamma=float(gamma),
        hw_valid=(HW if HW_pad != HW else None),
    )

    total_px = N * HW
    cost = pl.CostEstimate(
        flops=int(30 * total_px),
        transcendentals=int((C + 2) * total_px),
        bytes_accessed=int((4 * C + 4) * total_px + 4 * N * 8 * 128),
    )

    partials = pl.pallas_call(
        kernel,
        out_shape=jax.ShapeDtypeStruct((N, 8, 128), jnp.float32),
        grid_spec=pltpu.PrefetchScalarGridSpec(
            num_scalar_prefetch=0,
            grid=(N, num_tiles),
            in_specs=[
                pl.BlockSpec((1, C, tile_r, L), lambda n, j: (n, 0, j, 0)),
                pl.BlockSpec((1, 1, tile_r, L), lambda n, j: (n, 0, j, 0)),
            ],
            out_specs=pl.BlockSpec((1, 8, 128), lambda n, j: (n, 0, 0)),
            scratch_shapes=[pltpu.VMEM((tile_r, L), jnp.float32)],
        ),
        compiler_params=pltpu.CompilerParams(
            dimension_semantics=("parallel", "arbitrary"),
        ),
        cost_estimate=cost,
    )(logits, tgt)

    # Per-sample partial sums live at [:, 0, 0]; reduction='mean'.
    return jnp.sum(partials[:, 0, 0]) / jnp.float32(total_px)


def _focal_loss_ref(inputs, targets, alpha=1.0, gamma=2.0):
    """Pure-JAX reference mirroring the PyTorch forward."""
    N, C, H, W = inputs.shape
    logits = jnp.transpose(inputs, (0, 2, 3, 1)).reshape(-1, C).astype(jnp.float32)
    tgt = targets.reshape(-1)
    logp = jax.nn.log_softmax(logits, axis=-1)
    ce = -jnp.take_along_axis(logp, tgt[:, None], axis=-1)[:, 0]
    pt = jnp.exp(-ce)
    fl = alpha * (1.0 - pt) ** gamma * ce
    return jnp.mean(fl)


if __name__ == "__main__":
    key = jax.random.PRNGKey(0)
    k1, k2 = jax.random.split(key)

    N, C, H, W = 2, 4, 16, 16
    inputs = jax.random.normal(k1, (N, C, H, W), dtype=jnp.float32)
    targets = jax.random.randint(k2, (N, H, W), 0, C, dtype=jnp.int32)

    loss = focal_loss_pallas(inputs, targets, alpha=1.0, gamma=2.0)
    loss = jax.block_until_ready(loss)

    ref = _focal_loss_ref(inputs, targets, alpha=1.0, gamma=2.0)
    assert jnp.allclose(loss, ref, rtol=1e-5, atol=1e-6), (loss, ref)

    print("KERNEL_OK")
</pallas_src>

<mosaic_0001>
module attributes {stable_mosaic.version = 11 : i64} {
  func.func @_focal_loss_kernel(%arg0: i32, %arg1: i32, %arg2: memref<1x4x8x256xf32, #tpu.memory_space<vmem>>, %arg3: memref<1x1x8x256xi32, #tpu.memory_space<vmem>>, %arg4: memref<1x8x128xf32, #tpu.memory_space<vmem>>, %arg5: memref<8x256xf32, #tpu.memory_space<vmem>>) attributes {dimension_semantics = [#tpu.dimension_semantics<parallel>, #tpu.dimension_semantics<arbitrary>], iteration_bounds = array<i64: 2, 1>, scalar_prefetch = 0 : i64, scratch_operands = 1 : i64, tpu.core_type = #tpu.core_type<tc>, window_params = [{transform_indices = @transform_0, window_bounds = array<i64: 1, 4, 8, 256>}, {transform_indices = @transform_1, window_bounds = array<i64: 1, 1, 8, 256>}, {transform_indices = @transform_2, window_bounds = array<i64: 1, 8, 128>}]} {
    %c0_i32 = arith.constant 0 : i32
    %0 = arith.cmpi eq, %arg1, %c0_i32 : i32
    %1 = arith.extui %0 : i1 to i32
    %c0_i32_0 = arith.constant 0 : i32
    %2 = arith.cmpi ne, %1, %c0_i32_0 : i32
    scf.if %2 {
      %cst_36 = arith.constant 0.000000e+00 : f32
      %84 = vector.broadcast %cst_36 : f32 to vector<8x256xf32>
      %c0_37 = arith.constant 0 : index
      %c0_38 = arith.constant 0 : index
      %85 = vector.load %arg5[%c0_37, %c0_38] : memref<8x256xf32, #tpu.memory_space<vmem>>, vector<8x256xf32>
      tpu.vector_store %arg5[%c0_37, %c0_38], %84 {strides = array<i32>} : memref<8x256xf32, #tpu.memory_space<vmem>>, vector<8x256xf32>,
    } else {
    }
    %c0 = arith.constant 0 : index
    %c0_1 = arith.constant 0 : index
    %c0_2 = arith.constant 0 : index
    %c0_3 = arith.constant 0 : index
    %3 = vector.load %arg3[%c0, %c0_1, %c0_2, %c0_3] : memref<1x1x8x256xi32, #tpu.memory_space<vmem>>, vector<1x1x8x256xi32>
    %4 = vector.shape_cast %3 : vector<1x1x8x256xi32> to vector<8x256xi32>
    %c0_4 = arith.constant 0 : index
    %c0_5 = arith.constant 0 : index
    %c0_6 = arith.constant 0 : index
    %c0_7 = arith.constant 0 : index
    %5 = vector.load %arg2[%c0_4, %c0_5, %c0_6, %c0_7] : memref<1x4x8x256xf32, #tpu.memory_space<vmem>>, vector<1x1x8x256xf32>
    %6 = vector.shape_cast %5 : vector<1x1x8x256xf32> to vector<8x256xf32>
    %c0_8 = arith.constant 0 : index
    %c1 = arith.constant 1 : index
    %c0_9 = arith.constant 0 : index
    %c0_10 = arith.constant 0 : index
    %7 = vector.load %arg2[%c0_8, %c1, %c0_9, %c0_10] : memref<1x4x8x256xf32, #tpu.memory_space<vmem>>, vector<1x1x8x256xf32>
    %8 = vector.shape_cast %7 : vector<1x1x8x256xf32> to vector<8x256xf32>
    %c0_11 = arith.constant 0 : index
    %c2 = arith.constant 2 : index
    %c0_12 = arith.constant 0 : index
    %c0_13 = arith.constant 0 : index
    %9 = vector.load %arg2[%c0_11, %c2, %c0_12, %c0_13] : memref<1x4x8x256xf32, #tpu.memory_space<vmem>>, vector<1x1x8x256xf32>
    %10 = vector.shape_cast %9 : vector<1x1x8x256xf32> to vector<8x256xf32>
    %c0_14 = arith.constant 0 : index
    %c3 = arith.constant 3 : index
    %c0_15 = arith.constant 0 : index
    %c0_16 = arith.constant 0 : index
    %11 = vector.load %arg2[%c0_14, %c3, %c0_15, %c0_16] : memref<1x4x8x256xf32, #tpu.memory_space<vmem>>, vector<1x1x8x256xf32>
    %12 = vector.shape_cast %11 : vector<1x1x8x256xf32> to vector<8x256xf32>
    %13 = arith.maximumf %6, %8 : vector<8x256xf32>
    %14 = arith.maximumf %13, %10 : vector<8x256xf32>
    %15 = arith.maximumf %14, %12 : vector<8x256xf32>
    %cst = arith.constant 0.000000e+00 : f32
    %16 = vector.broadcast %cst : f32 to vector<8x256xf32>
    %cst_17 = arith.constant 0.000000e+00 : f32
    %17 = vector.broadcast %cst_17 : f32 to vector<8x256xf32>
    %18 = arith.subf %6, %15 : vector<8x256xf32>
    %19 = math.exp %18 : vector<8x256xf32>
    %20 = arith.addf %16, %19 : vector<8x256xf32>
    %c0_i32_18 = arith.constant 0 : i32
    %21 = vector.broadcast %c0_i32_18 : i32 to vector<8x256xi32>
    %22 = arith.cmpi eq, %4, %21 : vector<8x256xi32>
    %cst_19 = arith.constant 0.000000e+00 : f32
    %23 = vector.broadcast %cst_19 : f32 to vector<8x256xf32>
    %24 = arith.select %22, %6, %23 : vector<8x256xi1>, vector<8x256xf32>
    %25 = arith.addf %17, %24 : vector<8x256xf32>
    %26 = arith.subf %8, %15 : vector<8x256xf32>
    %27 = math.exp %26 : vector<8x256xf32>
    %28 = arith.addf %20, %27 : vector<8x256xf32>
    %c1_i32 = arith.constant 1 : i32
    %29 = vector.broadcast %c1_i32 : i32 to vector<8x256xi32>
    %30 = arith.cmpi eq, %4, %29 : vector<8x256xi32>
    %cst_20 = arith.constant 0.000000e+00 : f32
    %31 = vector.broadcast %cst_20 : f32 to vector<8x256xf32>
    %32 = arith.select %30, %8, %31 : vector<8x256xi1>, vector<8x256xf32>
    %33 = arith.addf %25, %32 : vector<8x256xf32>
    %34 = arith.subf %10, %15 : vector<8x256xf32>
    %35 = math.exp %34 : vector<8x256xf32>
    %36 = arith.addf %28, %35 : vector<8x256xf32>
    %c2_i32 = arith.constant 2 : i32
    %37 = vector.broadcast %c2_i32 : i32 to vector<8x256xi32>
    %38 = arith.cmpi eq, %4, %37 : vector<8x256xi32>
    %cst_21 = arith.constant 0.000000e+00 : f32
    %39 = vector.broadcast %cst_21 : f32 to vector<8x256xf32>
    %40 = arith.select %38, %10, %39 : vector<8x256xi1>, vector<8x256xf32>
    %41 = arith.addf %33, %40 : vector<8x256xf32>
    %42 = arith.subf %12, %15 : vector<8x256xf32>
    %43 = math.exp %42 : vector<8x256xf32>
    %44 = arith.addf %36, %43 : vector<8x256xf32>
    %c3_i32 = arith.constant 3 : i32
    %45 = vector.broadcast %c3_i32 : i32 to vector<8x256xi32>
    %46 = arith.cmpi eq, %4, %45 : vector<8x256xi32>
    %cst_22 = arith.constant 0.000000e+00 : f32
    %47 = vector.broadcast %cst_22 : f32 to vector<8x256xf32>
    %48 = arith.select %46, %12, %47 : vector<8x256xi1>, vector<8x256xf32>
    %49 = arith.addf %41, %48 : vector<8x256xf32>
    %50 = math.log %44 : vector<8x256xf32>
    %51 = arith.addf %15, %50 : vector<8x256xf32>
    %52 = arith.subf %51, %49 : vector<8x256xf32>
    %cst_23 = arith.constant 0.000000e+00 : f32
    %53 = vector.broadcast %cst_23 : f32 to vector<8x256xf32>
    %54 = arith.maximumf %52, %53 : vector<8x256xf32>
    %cst_24 = arith.constant 0.000000e+00 : f32
    %55 = vector.broadcast %cst_24 : f32 to vector<8x256xf32>
    %56 = arith.subf %55, %54 : vector<8x256xf32>
    %57 = math.exp %56 : vector<8x256xf32>
    %cst_25 = arith.constant 1.000000e+00 : f32
    %58 = vector.broadcast %cst_25 : f32 to vector<8x256xf32>
    %59 = arith.subf %58, %57 : vector<8x256xf32>
    %cst_26 = arith.constant 1.000000e+00 : f32
    %60 = vector.broadcast %cst_26 : f32 to vector<8x256xf32>
    %61 = arith.mulf %60, %59 : vector<8x256xf32>
    %62 = arith.mulf %61, %59 : vector<8x256xf32>
    %cst_27 = arith.constant 1.000000e+00 : f32
    %63 = vector.broadcast %cst_27 : f32 to vector<8x256xf32>
    %64 = arith.mulf %63, %62 : vector<8x256xf32>
    %65 = arith.mulf %64, %54 : vector<8x256xf32>
    %66 = tpu.iota {dimensions = array<i32: 0>} : vector<8x256xi32>
    %67 = tpu.iota {dimensions = array<i32: 1>} : vector<8x256xi32>
    %c8_i32 = arith.constant 8 : i32
    %68 = arith.muli %arg1, %c8_i32 : i32
    %69 = vector.broadcast %68 : i32 to vector<8x256xi32>
    %70 = arith.addi %69, %66 : vector<8x256xi32>
    %c256_i32 = arith.constant 256 : i32
    %71 = vector.broadcast %c256_i32 : i32 to vector<8x256xi32>
    %72 = arith.muli %70, %71 : vector<8x256xi32>
    %73 = arith.addi %72, %67 : vector<8x256xi32>
    %c256_i32_28 = arith.constant 256 : i32
    %74 = vector.broadcast %c256_i32_28 : i32 to vector<8x256xi32>
    %75 = arith.cmpi slt, %73, %74 : vector<8x256xi32>
    %cst_29 = arith.constant 0.000000e+00 : f32
    %76 = vector.broadcast %cst_29 : f32 to vector<8x256xf32>
    %77 = arith.select %75, %65, %76 : vector<8x256xi1>, vector<8x256xf32>
    %c0_30 = arith.constant 0 : index
    %c0_31 = arith.constant 0 : index
    %78 = vector.load %arg5[%c0_30, %c0_31] : memref<8x256xf32, #tpu.memory_space<vmem>>, vector<8x256xf32>
    %79 = arith.addf %78, %77 : vector<8x256xf32>
    %c0_32 = arith.constant 0 : index
    %c0_33 = arith.constant 0 : index
    %80 = vector.load %arg5[%c0_32, %c0_33] : memref<8x256xf32, #tpu.memory_space<vmem>>, vector<8x256xf32>
    tpu.vector_store %arg5[%c0_32, %c0_33], %79 {strides = array<i32>} : memref<8x256xf32, #tpu.memory_space<vmem>>, vector<8x256xf32>,
    %c0_i32_34 = arith.constant 0 : i32
    %81 = arith.cmpi eq, %arg1, %c0_i32_34 : i32
    %82 = arith.extui %81 : i1 to i32
    %c0_i32_35 = arith.constant 0 : i32
    %83 = arith.cmpi ne, %82, %c0_i32_35 : i32
    scf.if %83 {
      %c0_36 = arith.constant 0 : index
      %c0_37 = arith.constant 0 : index
      %84 = vector.load %arg5[%c0_36, %c0_37] : memref<8x256xf32, #tpu.memory_space<vmem>>, vector<8x256xf32>
      %85 = vector.shape_cast %84 : vector<8x256xf32> to vector<1x8x256xf32>
      %cst_38 = arith.constant dense<0.000000e+00> : vector<1xf32>
      %86 = vector.multi_reduction <add>, %85, %cst_38 [1, 2] : vector<1x8x256xf32> to vector<1xf32>
      %87 = vector.shape_cast %86 : vector<1xf32> to vector<1x1x1xf32>
      %88 = vector.extract %87[0, 0, 0] : f32 from vector<1x1x1xf32>
      %89 = vector.broadcast %88 : f32 to vector<1x8x128xf32>
      %c0_39 = arith.constant 0 : index
      %c0_40 = arith.constant 0 : index
      %c0_41 = arith.constant 0 : index
      %90 = vector.load %arg4[%c0_39, %c0_40, %c0_41] : memref<1x8x128xf32, #tpu.memory_space<vmem>>, vector<1x8x128xf32>
      tpu.vector_store %arg4[%c0_39, %c0_40, %c0_41], %89 {strides = array<i32>} : memref<1x8x128xf32, #tpu.memory_space<vmem>>, vector<1x8x128xf32>,
    } else {
    }
    return
  }
  func.func @transform_0(%arg0: i32, %arg1: i32) -> (i32, i32, i32, i32) {
    %c0_i32 = arith.constant 0 : i32
    %c0_i32_0 = arith.constant 0 : i32
    %c0_i32_1 = arith.constant 0 : i32
    return %arg0, %c0_i32, %arg1, %c0_i32_0 : i32, i32, i32, i32
  }
  func.func @transform_1(%arg0: i32, %arg1: i32) -> (i32, i32, i32, i32) {
    %c0_i32 = arith.constant 0 : i32
    %c0_i32_0 = arith.constant 0 : i32
    %c0_i32_1 = arith.constant 0 : i32
    return %arg0, %c0_i32, %arg1, %c0_i32_0 : i32, i32, i32, i32
  }
  func.func @transform_2(%arg0: i32, %arg1: i32) -> (i32, i32, i32) {
    %c0_i32 = arith.constant 0 : i32
    %c0_i32_0 = arith.constant 0 : i32
    %c0_i32_1 = arith.constant 0 : i32
    return %arg0, %c0_i32, %c0_i32_0 : i32, i32, i32
  }
}

</mosaic_0001>

<bundles_post_ra>
// kernel: tpu_custom_call.1
= control target key start
LH: loop header
LB: loop body
LE: loop exit
PB: predicated region body
PF: predicated region fallthrough
CT: control target
= control target key end

     0   :  { %7 = vsyncpa [#allocation4], 0  ;;  %s1025_s0 = inlined_call_operand.hbm [shape: f32[2,4,8,256], index: 0, kind: input, shape index: {}]   ;;  %s1026_s1 = inlined_call_operand.hbm [shape: s32[2,1,8,256], index: 1, kind: input, shape index: {}]   ;;  %s1027_s2 = inlined_call_operand.hbm [shape: f32[2,8,128], index: 2, kind: output, shape index: {}]  }
   0x1   :  { %9 = vsyncpa [#allocation4 + $0x1], 0 }
   0x2   :  { %10 = vsyncpa [#allocation7], 0 }
   0x3   :  { %12 = vsyncpa [#allocation7 + $0x1], 0 }
   0x4   :  { %13 = vsyncpa [#allocation5], 0 }
   0x5   :  { %15 = vsyncpa [#allocation5 + $0x1], 0  ;;  %s771_s9 = smov 0   ;;  %s773_s10 = smov 0  }
   0x6   :  { %s775_s11 = smov 0   ;;  %s777_s12 = smov 0  }
   0x7   :  { %s779_s13 = smov 0   ;;  %s781_s14 = smov 0  }
   0x8 LB: > { %s482_s15 = sadd.s32 4294967295, %s749_s14   ;;  %s483_s16 = sadd.s32 4294967294, %s749_s14   ;;  %s749_s14 = sphi %s781_s14, %s21_s14   ;;  %s745_s13 = sphi %s779_s13, %s1046_s13   ;;  %s741_s12 = sphi %s777_s12, %s1045_s12   ;;  %s737_s11 = sphi %s775_s11, %s1044_s11   ;;  %s733_s10 = sphi %s773_s10, %s1043_s10   ;;  %s729_s9 = sphi %s771_s9, %s1042_s9  }
   0x9   : > { %s33_s17 = sadd.s32 1, %s745_s13  ;;  %s42_s18 = sadd.s32 1, %s737_s11 }
   0xa   : > { %p35_p0 = scmp.ge.s32.totalorder %s33_s17, 2  ;;  %p49_p1 = scmp.ne.s32.totalorder %s737_s11, %s733_s10 }
   0xb   : > { %p50_p2 = scmp.eq.s32.totalorder %s749_s14, 0  ;;  %p55_p3 = scmp.ne.s32.totalorder %s733_s10, %s729_s9 }
   0xc   : > { %s1048_s17 = smov (%p35_p0, %s33_s17), 0  ;;  %p56_p5 = scmp.eq.s32.totalorder %s482_s15, 0 }
   0xd   : > { %p812_p4 = por %p50_p2, %p49_p1  ;;  %s37_s20 = ssub.s32 %s745_s13, %s1048_s17 }
   0xe   : > { %p107_p6 = scmp.eq.s32.totalorder %s482_s15, 1  ;;  %p40_p7 = scmp.eq.s32.totalorder %s37_s20, 0 }
   0xf   : > { %p818_p8 = por %p56_p5, %p55_p3  ;;  %p113_p10 = scmp.eq.s32.totalorder %s483_s16, 1 }
  0x10   : > { %p822_p9 = por %p107_p6, %p49_p1  ;;  %p527_p13 = scmp.lt.s32.totalorder %s749_s14, 2 }
  0x11   : > { %s1031_s21 = scalar_select %p818_p8, 1, 0 }
  0x12   : > { %s1032_s22 = scalar_select %p822_p9, 1, 0 }
  0x13   : > { %s827_s23 = scalar_select %p40_p7, %s737_s11, %s42_s18  }
  0x14   : > { %p829_p11 = por %p113_p10, %p55_p3  ;;  %s836_s25 = sand.u32 1, %s737_s11  }
  0x15   : > { %s486_s26 = sshll.u32 %s836_s25, 6  ;;  %s506_s27 = sshll.u32 %s745_s13, 10 }
  0x16   : > { %s1033_s24 = scalar_select %p829_p11, 1, 0 }
  0x17   : > { %s843_s30 = scalar_lea.hbm %s1025_s0, %s506_s27  ;;  %s137_s3 = scalar_lea.vmem [#allocation3], %s486_s26 }
  0x18   : > { %s146_s4 = sshll.u32 %s137_s3, 4  ;;  %p849_p0 = pnand %p527_p13, %p812_p4  ;;  %s845_s4 = int_to_ptr.vmem [resolvable:$true] %s146_s4 }
  0x19   : > { %s134_s6 = scalar_lea.sflag [#allocation4], %s836_s25  ;;  %s603_s7 = scalar_lea.hbm %s843_s30, 1024 }
  0x1a   : > { %p604_p2 = scmp.ne.s32.totalorder %s843_s30, %s603_s7  ;;  %p605_p3 = pneg %p849_p0 }
  0x1b   : > { %s608_s16 = scalar_lea.hbm %s1025_s0, 2048  ;;  %p609_p4 = scmp.lt.u32.totalorder %s843_s30, %s1025_s0 }
  0x1c   : > { %p606_p5 = pnand %p605_p3, %p604_p2  ;;  %p610_p7 = scmp.lt.u32.totalorder %s608_s16, %s603_s7 }
  0x1d   : > { %p612_p13 = scmp.lt.u32.totalorder %s603_s7, %s843_s30 }
  0x1e   : > { %p607_p6 = pneg %p606_p5  ;;  %p611_p10 = por %p610_p7, %p609_p4 }
  0x20   : > { %p613_p12 = por %p612_p13, %p611_p10 }
  0x22   : > { %p614_p1 = pnand %p613_p12, %p607_p6 }
  0x24   : > { %617 = shalt.err (!%p614_p1)
}
  0x25   : > { %s618_s20 = scalar_lea.vmem %s845_s4, 1024  ;;  %s751_s26 = smov [#allocation3]  }
  0x26   : > { %p619_p2 = scmp.ne.s32.totalorder %s845_s4, %s618_s20  ;;  %s623_s27 = sshll.u32 %s751_s26, 4  ;;  %s624_s27 = int_to_ptr.vmem [resolvable:$false] %s623_s27 }
  0x27   : > { %s625_s28 = scalar_lea.vmem %s624_s27, 2048  ;;  %p626_p9 = scmp.lt.s32.totalorder %s845_s4, %s624_s27 }
  0x28   : > { %p621_p5 = pnand %p619_p2, %p605_p3  ;;  %p627_p4 = scmp.lt.s32.totalorder %s625_s28, %s618_s20 }
  0x2a   : > { %p622_p11 = pneg %p621_p5  ;;  %p628_p7 = por %p627_p4, %p626_p9 }
  0x2c   : > { %p629_p10 = pnand %p628_p7, %p622_p11 }
  0x2e   : > { %632 = shalt.err (!%p629_p10)
}
  0x2f   : > { %s752_s29 = smov 256   ;;  %s753_s3 = smov 16  }
  0x30   : > { %519 = dma.hbm_to_vmem [thread:$0]  (!%p849_p0), %s843_s30, 1024, %s845_s4, %s134_s6, %s752_s29, %s752_s29, %s753_s3  }
  0x31   : > { %p175_p12 = scmp.lt.s32.totalorder %s749_s14, 3  ;;  %s489_s7 = sshll.u32 %s836_s25, 4 }
  0x32   : > { %s507_s8 = sshll.u32 %s745_s13, 8  ;;  %p1035_p9 = scmp.ge.s32.totalorder %s749_s14, 1 }
  0x33   : > { %s894_s19 = scalar_lea.hbm %s1026_s1, %s507_s8  ;;  %s160_s20 = scalar_lea.vmem [#allocation6], %s489_s7 }
  0x34   : > { %p887_p11 = pnand %p1035_p9, %p175_p12  ;;  %s170_s26 = sshll.u32 %s160_s20, 4  ;;  %s171_s26 = int_to_ptr.vmem [resolvable:$true] %s170_s26 }
  0x35   : > { %s157_s30 = scalar_lea.sflag [#allocation7], %s836_s25  ;;  %s633_s4 = scalar_lea.hbm %s894_s19, 256 }
  0x36   : > { %s1036_s15 = scalar_select %p887_p11, 1, 0 }
  0x37   : > { %p634_p1 = scmp.ne.s32.totalorder %s894_s19, %s633_s4  ;;  %s638_s28 = scalar_lea.hbm %s1026_s1, 512 }
  0x38   : > { %p639_p2 = scmp.lt.u32.totalorder %s894_s19, %s1026_s1  ;;  %p640_p5 = scmp.lt.u32.totalorder %s638_s28, %s633_s4 }
  0x39   : > { %p636_p6 = pnand %p634_p1, %p605_p3  ;;  %p642_p7 = scmp.lt.u32.totalorder %s633_s4, %s894_s19 }
  0x3a   : > { %p641_p4 = por %p640_p5, %p639_p2 }
  0x3b   : > { %p637_p13 = pneg %p636_p6 }
  0x3c   : > { %p643_p10 = por %p642_p7, %p641_p4 }
  0x3e   : > { %p644_p12 = pnand %p643_p10, %p637_p13 }
  0x40   : > { %647 = shalt.err (!%p644_p12)
}
  0x41   : > { %s648_s25 = scalar_lea.vmem %s171_s26, 256  ;;  %s754_s7 = smov [#allocation6]  }
  0x42   : > { %p649_p9 = scmp.ne.s32.totalorder %s171_s26, %s648_s25  ;;  %s653_s8 = sshll.u32 %s754_s7, 4  ;;  %s654_s8 = int_to_ptr.vmem [resolvable:$false] %s653_s8 }
  0x43   : > { %s655_s16 = scalar_lea.vmem %s654_s8, 512  ;;  %p656_p8 = scmp.lt.s32.totalorder %s171_s26, %s654_s8 }
  0x44   : > { %p651_p1 = pnand %p649_p9, %p605_p3  ;;  %p657_p11 = scmp.lt.s32.totalorder %s655_s16, %s648_s25 }
  0x46   : > { %p652_p6 = pneg %p651_p1  ;;  %p658_p2 = por %p657_p11, %p656_p8 }
  0x48   : > { %p659_p5 = pnand %p658_p2, %p652_p6 }
  0x4a   : > { %662 = shalt.err (!%p659_p5)
}
  0x4b   : > { %522 = dma.hbm_to_vmem [thread:$0]  (!%p849_p0), %s894_s19, 256, %s171_s26, %s157_s30  }
  0x4c   : > { %p1037_p13 = scmp.ne.s32.totalorder %s1036_s15, 0 }
  0x4d   : > { %s919_s18 = sand.u32 (!%p1037_p13), 1, %s733_s10   ;;  %p1038_p3 = scmp.ne.s32.totalorder (!%p1037_p13), %s1031_s21, 0 }
  0x4e   : > { %179 = sbr.rel (%p1037_p13) target bundleno = 383 (0x17f), region = 28  ;;  %s493_s20 = sshll.u32 (!%p1037_p13), %s919_s18, 6 }
  0x4f   : > { %s182_s4 = scalar_lea.sflag (!%p1037_p13), [#allocation4], %s919_s18  ;;  %s185_s6 = scalar_lea.vmem (!%p1037_p13), [#allocation3], %s493_s20 }
  0x55   : > { %716 = dma.done.wait (%p1038_p3), %s182_s4, 1024  }
  0x56   : > { %718 = vsyncadd (%p1038_p3), %s182_s4, 4294966272  ;;  %s494_s5 = sshll.u32 %s919_s18, 4  ;;  %s191_s15 = scalar_lea.sflag [#allocation7], %s919_s18 }
  0x57   : > { %s929_s19 = scalar_lea.vmem [#allocation6], %s494_s5 }
  0x58   : > { %720 = dma.done.wait (%p1038_p3), %s191_s15, 256  }
  0x59   : > { %722 = vsyncadd (%p1038_p3), %s191_s15, 4294967040  ;;  %v228_v0 = vld [vmem:[%s185_s6] sm:$0xff]  ;;  %v229_v1 = vld [vmem:[%s185_s6 + $0x8] sm:$0xff]  ;;  %s495_s21 = sshll.u32 %s919_s18, 3  ;;  %s503_s27 = sshll.u32 %s741_s12, 7 }
  0x5a   : > { %v496_v2 = vld [vmem:[%s185_s6 + $0x10] sm:$0xff]  ;;  %v497_v3 = vld [vmem:[%s185_s6 + $0x18] sm:$0xff]  ;;  %v935_v4 = vld [vmem:[%s185_s6 + $0x20] sm:$0xff]  ;;  %s219_s26 = scalar_lea.vmem [#allocation8], %s495_s21  ;;  %s978_s25 = scalar_lea.hbm %s1027_s2, %s503_s27 }
  0x5b   : > { %v937_v5 = vld [vmem:[%s185_s6 + $0x28] sm:$0xff]  ;;  %v239_v6 = vmax.f32 %v228_v0, %v496_v2  ;;  %v240_v7 = vmax.f32 %v229_v1, %v497_v3  ;;  %v939_v8 = vld [vmem:[%s185_s6 + $0x30] sm:$0xff]  ;;  %v941_v9 = vld [vmem:[%s185_s6 + $0x38] sm:$0xff]  ;;  %s375_s30 = sshll.u32 %s219_s26, 4  ;;  %s362_s7 = scalar_lea.sflag [#allocation5], %s919_s18  ;;  %s973_s30 = int_to_ptr.vmem [resolvable:$true] %s375_s30 }
  0x5c   : > { %v226_v34 = vld [vmem:[%s929_s19] sm:$0xff]  ;;  %v227_v37 = vld [vmem:[%s929_s19 + $0x8] sm:$0xff]  ;;  %s663_s8 = scalar_lea.vmem %s973_s30, 128  ;;  %p1039_p0 = scmp.ne.s32.totalorder %s1032_s22, 0 }
  0x5d   : > { %v241_v10 = vmax.f32 %v239_v6, %v935_v4  ;;  %v242_v11 = vmax.f32 %v240_v7, %v937_v5  ;;  %vm253_vm0 = vcmp.eq.s32.totalorder %v226_v34, 0  ;;  %vm267_vm1 = vcmp.eq.s32.totalorder %v226_v34, 1  ;;  %p664_p8 = scmp.ne.s32.totalorder %s973_s30, %s663_s8  ;;  %s755_s12 = smov [#allocation8]  }
  0x5e   : > { %vm254_vm2 = vcmp.eq.s32.totalorder %v227_v37, 0  ;;  %vm268_vm3 = vcmp.eq.s32.totalorder %v227_v37, 1  ;;  %v255_v46 = vsel %vm253_vm0, %v228_v0, 0.0  ;;  %v269_v47 = vsel %vm267_vm1, %v496_v2, 0.0  ;;  %s667_s16 = sshll.u32 %s755_s12, 4  ;;  %s668_s16 = int_to_ptr.vmem [resolvable:$false] %s667_s16 }
  0x5f   : > { %v946_v12 = vmax.f32 %v241_v10, %v939_v8  ;;  %v949_v13 = vmax.f32 %v242_v11, %v941_v9  ;;  %v256_v48 = vsel %vm254_vm2, %v229_v1, 0.0  ;;  %v270_v49 = vsel %vm268_vm3, %v497_v3, 0.0  ;;  %p665_p11 = pnand %p664_p8, %p1039_p0  ;;  %s669_s20 = scalar_lea.vmem %s668_s16, 256 }
  0x60   : > { %vm281_vm4 = vcmp.eq.s32.totalorder %v226_v34, 2  ;;  %vm282_vm5 = vcmp.eq.s32.totalorder %v227_v37, 2  ;;  %v271_v50 = vadd.f32 %v269_v47, %v255_v46  ;;  %v272_v51 = vadd.f32 %v270_v49, %v256_v48  ;;  %p670_p7 = scmp.lt.s32.totalorder %s973_s30, %s668_s16  ;;  %p671_p10 = scmp.lt.s32.totalorder %s669_s20, %s663_s8 }
  0x61   : > { %v245_v14 = vsub.f32 %v228_v0, %v946_v12  ;;  %v246_v15 = vsub.f32 %v229_v1, %v949_v13  ;;  %v259_v16 = vsub.f32 %v496_v2, %v946_v12  ;;  %v260_v17 = vsub.f32 %v497_v3, %v949_v13  ;;  %p666_p4 = pneg %p665_p11 }
  0x62   : > { %v273_v18 = vsub.f32 %v935_v4, %v946_v12  ;;  %v274_v19 = vsub.f32 %v937_v5, %v949_v13  ;;  %v287_v23 = vsub.f32 %v939_v8, %v946_v12  ;;  %v288_v25 = vsub.f32 %v941_v9, %v949_v13  ;;  %p672_p12 = por %p671_p10, %p670_p7 }
  0x63   : > { %v247_v20 = vmul.f32 1.442695, %v245_v14  ;;  %v249_v21 = vmul.f32 1.442695, %v246_v15  ;;  %v261_v22 = vmul.f32 1.442695, %v259_v16 }
  0x64   : > { %v263_v24 = vmul.f32 1.442695, %v260_v17  ;;  %v275_v26 = vmul.f32 1.442695, %v273_v18  ;;  %v277_v27 = vmul.f32 1.442695, %v274_v19  ;;  %p673_p9 = pnand %p672_p12, %p666_p4 }
  0x65   : > { %579 = vpow2.f32 %v247_v20  ;;  %v289_v28 = vmul.f32 1.442695, %v287_v23  ;;  %v291_v29 = vmul.f32 1.442695, %v288_v25  ;;  %v283_v52 = vsel %vm281_vm4, %v935_v4, 0.0 }
  0x66   : > { %581 = vpow2.f32 %v249_v21  ;;  %v284_v53 = vsel %vm282_vm5, %v937_v5, 0.0  ;;  %vm295_vm6 = vcmp.eq.s32.totalorder %v226_v34, 3  ;;  %vm296_vm7 = vcmp.eq.s32.totalorder %v227_v37, 3 }
  0x67   : > { %583 = vpow2.f32 %v261_v22  ;;  %v285_v54 = vadd.f32 %v283_v52, %v271_v50  ;;  %v286_v55 = vadd.f32 %v284_v53, %v272_v51  ;;  %v297_v56 = vsel %vm295_vm6, %v939_v8, 0.0 }
  0x68   : > { %585 = vpow2.f32 %v263_v24  ;;  %v298_v57 = vsel %vm296_vm7, %v941_v9, 0.0  ;;  %v323_v8 = vlaneseq }
  0x69   : > { %587 = vpow2.f32 %v275_v26  ;;  %v299_v60 = vadd.f32 %v297_v56, %v285_v54  ;;  %v300_v62 = vadd.f32 %v298_v57, %v286_v55 }
  0x6a   : > { %589 = vpow2.f32 %v277_v27  ;;  %v324_v9 = vshrl.u32 %v323_v8, 7  ;;  %v326_v14 = vand.u32 127, %v323_v8 }
  0x6b   : > { %591 = vpow2.f32 %v289_v28 }
  0x6c   : > { %593 = vpow2.f32 %v291_v29  ;;  %v331_v15 = vmul.u32 256, %v324_v9  ;;  %v327_v16 = vadd.s32 128, %v326_v14 }
  0x6e   : > { %v332_v18 = vadd.s32 %v331_v15, %v326_v14 }
  0x6f   : > { %v580_v30 = vpop.eup %579 }
  0x70   : > { %v582_v31 = vpop.eup %581  ;;  %vm334_vm8 = vcmp.lt.s32.totalorder %v332_v18, 256 }
  0x71   : > { %v584_v32 = vpop.eup %583 }
  0x72   : > { %v586_v33 = vpop.eup %585  ;;  %v265_v35 = vadd.f32 %v584_v32, %v580_v30 }
  0x73   : > { %v588_v36 = vpop.eup %587  ;;  %v266_v38 = vadd.f32 %v586_v33, %v582_v31 }
  0x74   : > { %v590_v39 = vpop.eup %589  ;;  %v279_v40 = vadd.f32 %v588_v36, %v265_v35 }
  0x75   : > { %v592_v41 = vpop.eup %591  ;;  %v280_v42 = vadd.f32 %v590_v39, %v266_v38 }
  0x76   : > { %v594_v43 = vpop.eup %593  ;;  %v293_v44 = vadd.f32 %v592_v41, %v279_v40 }
  0x77   : > { %v294_v45 = vadd.f32 %v594_v43, %v280_v42 }
  0x78   : > { %595 = vlog2.f32 %v293_v44 }
  0x79   : > { %597 = vlog2.f32 %v294_v45 }
  0x82   : > { %v596_v58 = vpop.eup %595 }
  0x83   : > { %v598_v59 = vpop.eup %597  ;;  %v302_v61 = vmul.f32 0.6931472, %v596_v58 }
  0x84   : > { %v304_v63 = vmul.f32 0.6931472, %v598_v59 }
  0x85   : > { %v305_v0 = vadd.f32 %v302_v61, %v946_v12 }
  0x86   : > { %v306_v1 = vadd.f32 %v304_v63, %v949_v13  ;;  %v333_v13 = vadd.s32 %v331_v15, %v327_v16 }
  0x87   : > { %v307_v2 = vsub.f32 %v305_v0, %v299_v60 }
  0x88   : > { %v308_v3 = vsub.f32 %v306_v1, %v300_v62  ;;  %vm335_vm9 = vcmp.lt.s32.totalorder %v333_v13, 256 }
  0x89   : > { %v309_v4 = vmax.f32 %v307_v2, 0.0 }
  0x8a   : > { %v310_v5 = vmax.f32 %v308_v3, 0.0 }
  0x8b   : > { %v311_v6 = vsub.f32 0.0, %v309_v4 }
  0x8c   : > { %v312_v7 = vsub.f32 0.0, %v310_v5 }
  0x8d   : > { %v313_v10 = vmul.f32 1.442695, %v311_v6 }
  0x8e   : > { %v315_v11 = vmul.f32 1.442695, %v312_v7 }
  0x8f   : > { %599 = vpow2.f32 %v313_v10 }
  0x90   : > { %601 = vpow2.f32 %v315_v11 }
  0x99   : > { %v600_v17 = vpop.eup %599 }
  0x9a   : > { %v602_v12 = vpop.eup %601  ;;  %v317_v19 = vsub.f32 1.0, %v600_v17 }
  0x9b   : > { %v318_v20 = vsub.f32 1.0, %v602_v12 }
  0x9c   : > { %v319_v21 = vmul.f32 %v317_v19, %v317_v19 }
  0x9d   : > { %v320_v22 = vmul.f32 %v318_v20, %v318_v20 }
  0x9e   : > { %v321_v23 = vmul.f32 %v319_v21, %v309_v4 }
  0x9f   : > { %v322_v24 = vmul.f32 %v320_v22, %v310_v5 }
  0xa0   : > { %v336_v25 = vsel %vm334_vm8, %v321_v23, 0.0 }
  0xa1   : > { %v337_v26 = vsel %vm335_vm9, %v322_v24, 0.0 }
  0xa2   : > { %v349_v27 = vadd.f32 %v337_v26, %v336_v25 }
  0xa4   : > { %350 = vadd.xlane.f32.xlu0 %v349_v27 }
 0x131   : > { %v351_v28 = vpop.xlane.xlu0 %350 }
 0x132   : > { %v352_v29 = vrot.slane %v351_v28, 4 }
 0x134   : > { %v353_v30 = vadd.f32 %v352_v29, %v351_v28 }
 0x136   : > { %v354_v31 = vrot.slane %v353_v30, 2 }
 0x138   : > { %v355_v32 = vadd.f32 %v354_v31, %v353_v30 }
 0x13a   : > { %v356_v33 = vrot.slane %v355_v32, 1 }
 0x13c   : > { %v357_v34 = vadd.f32 %v356_v33, %v355_v32 }
 0x13e   : > { %508 = vpush %v357_v34 }
 0x16f   : > { %s509_s28 = spop %508 }
 0x170   : > { %v359_v35 = vstv %s509_s28 }
 0x171   : > { %360 = vst [vmem:[%s219_s26] sm:$0xff] %v359_v35 }
 0x172   : > { %676 = shalt.err (!%p673_p9)
}
 0x173   : > { %s677_s18 = scalar_lea.hbm %s978_s25, 128  ;;  %s681_s5 = scalar_lea.hbm %s1027_s2, 256 }
 0x174   : > { %p678_p1 = scmp.ne.s32.totalorder %s978_s25, %s677_s18  ;;  %p682_p5 = scmp.lt.u32.totalorder %s978_s25, %s1027_s2 }
 0x175   : > { %p683_p13 = scmp.lt.u32.totalorder %s681_s5, %s677_s18  ;;  %p685_p8 = scmp.lt.u32.totalorder %s677_s18, %s978_s25 }
 0x176   : > { %p679_p6 = pnand %p678_p1, %p1039_p0 }
 0x177   : > { %p684_p3 = por %p683_p13, %p682_p5 }
 0x178   : > { %p680_p2 = pneg %p679_p6 }
 0x179   : > { %p686_p11 = por %p685_p8, %p684_p3 }
 0x17b   : > { %p687_p4 = pnand %p686_p11, %p680_p2 }
 0x17d   : > { %690 = shalt.err (!%p687_p4)
}
 0x17e   : > { %514 = dma.vmem_to_hbm [thread:$0]  (%p1039_p0), %s973_s30, 128, %s978_s25, %s362_s7  }
 0x17f PF: > { %s387_s21 = sand.u32 1, %s729_s9   ;;  %p1040_p7 = scmp.ne.s32.totalorder %s1033_s24, 0 }
 0x180   : > { %p1041_p10 = scmp.ge.s32.totalorder %s749_s14, 2  ;;  %s388_s26 = scalar_lea.sflag [#allocation5], %s387_s21 }
 0x182   : > { %p524_p12 = pnand %p1041_p10, %p1040_p7 }
 0x184   : > { %724 = dma.done.wait (!%p524_p12), %s388_s26, 128  }
 0x185   : > { %726 = vsyncadd (!%p524_p12), %s388_s26, 4294967168  ;;  %s21_s14 = sadd.s32 1, %s749_s14   ;;  %s1042_s9 = smov %s733_s10 }
 0x186   : > { %p18_p9 = scmp.ge.s32.totalorder %s21_s14, 4   ;;  %s1043_s10 = smov %s737_s11 }
 0x187   : > { %s1044_s11 = smov %s827_s23  ;;  %s1045_s12 = smov %s745_s13 }
 0x188   : > { %s1046_s13 = smov %s1048_s17  ;;  %20 = sbr.rel (!%p18_p9) target bundleno = 8 (0x8), region = 97 }
 0x18f   :  { %393 = vsyncpa [#allocation4], 1 }
 0x190   :  { %395 = vsyncpa [#allocation4 + $0x1], 1 }
 0x191   :  { %396 = vsyncpa [#allocation7], 1 }
 0x192   :  { %398 = vsyncpa [#allocation7 + $0x1], 1 }
 0x193   :  { %399 = vsyncpa [#allocation5], 1 }
 0x194   :  { %401 = vsyncpa [#allocation5 + $0x1], 1 }

</bundles_post_ra>
